<compile_context>
chip_gen: v6e
topology: v6e:2x2x1
jax: 0.10.0
libtpu: 0.0.40
codegen_flags: <defaults>
</compile_context>

<pallas_src>
import jax
import jax.numpy as jnp
from jax.experimental import pallas as pl
from jax.experimental.pallas import tpu as pltpu


def _round_up(n, m):
    return ((n + m - 1) // m) * m


def _make_qnet_kernel(num_linear, activation_type):
    """Builds a fused MLP kernel for `num_linear` Linear layers."""

    def act(h):
        if activation_type == "relu":
            return jnp.maximum(h, 0.0)
        return jnp.tanh(h)

    def kernel(*refs):
        # refs = (x_ref, w0, b0, w1, b1, ..., w_{L-1}, b_{L-1}, out_ref)
        x_ref = refs[0]
        out_ref = refs[-1]
        param_refs = refs[1:-1]

        h = x_ref[...]                          # bf16 activations in
        for layer in range(num_linear):
            w_ref = param_refs[2 * layer]       # bf16 (in_p, out_p), resident
            b_ref = param_refs[2 * layer + 1]   # f32  (1, out_p),   resident
            # bf16 x bf16 -> f32 accumulation on the MXU (single pass).
            h = jnp.dot(h.astype(jnp.bfloat16), w_ref[...],
                        preferred_element_type=jnp.float32)
            h = h + b_ref[...]                  # broadcasts over batch rows (f32 VPU)
            if layer < num_linear - 1:          # no activation after final layer
                h = act(h)
        out_ref[...] = h.astype(out_ref.dtype)

    return kernel


def _vmem_estimate_bytes(tile_batch, pdims, num_steps):
    """Rough VMEM footprint of the resident-weight fused MLP."""
    # Resident bf16 weights + f32 biases (single-buffered).
    w_bytes = sum(pdims[i] * pdims[i + 1] * 2 + pdims[i + 1] * 4
                  for i in range(len(pdims) - 1))
    # x (bf16) and out (f32) tiles, double-buffered when there is a pipeline.
    bufs = 2 if num_steps > 1 else 1
    io_bytes = bufs * tile_batch * (pdims[0] * 2 + pdims[-1] * 4)
    # Intermediate activations (f32), widest layer, with slack.
    act_bytes = 2 * tile_batch * max(pdims) * 4
    return w_bytes + io_bytes + act_bytes


def qnet_forward(x, params, *, activation_type="relu", tile_batch=None):
    """Fused Pallas forward pass of Qnet.

    x:      (B, input_dim) float32 or bfloat16
    params: list of (W, b) with W: (in, out), b: (1, out) or (out,)  (f32)
    """
    B, D = x.shape
    num_linear = len(params)
    num_actions = params[-1][0].shape[1]

    # ---- pad every feature dimension to a multiple of 128 (lane-dense) ----
    dims = [D] + [w.shape[1] for (w, _) in params]
    pdims = [_round_up(d, 128) for d in dims]
    D_pad, A_pad = pdims[0], pdims[-1]

    padded_params = []
    for li, (w, b) in enumerate(params):
        in_p, out_p = pdims[li], pdims[li + 1]
        if w.shape == (in_p, out_p):
            wp = w.astype(jnp.bfloat16)
        else:
            wp = jnp.zeros((in_p, out_p), jnp.bfloat16)
            wp = wp.at[: w.shape[0], : w.shape[1]].set(w.astype(jnp.bfloat16))
        b2 = b.reshape(1, -1)
        if b2.shape[1] == out_p:
            bp = b2.astype(jnp.float32)
        else:
            bp = jnp.zeros((1, out_p), jnp.float32)
            bp = bp.at[:, : b2.shape[1]].set(b2.astype(jnp.float32))
        padded_params.append((wp, bp))

    # ---- batch tiling ----
    # Tiny B: single un-tiled step (no pipeline overhead).
    # Otherwise: even number of grid steps (v7x has 2 TensorCores and the
    # parallel grid axis is sharded across them) with tiles up to ~1024 rows
    # to amortize the fixed per-step cost and make large, efficient DMAs.
    if tile_batch is None:
        if B <= 128:
            tile_batch = _round_up(B, 16)   # bf16 sublane packing
            num_steps = 1
        else:
            steps = pl.cdiv(B, 1024)
            if steps % 2 == 1:
                steps += 1                   # even split across 2 TCs (v7x)
            tile_batch = _round_up(pl.cdiv(B, steps), 128)
            num_steps = steps
        B_pad = tile_batch * num_steps
    else:
        B_pad = _round_up(B, tile_batch)
        num_steps = B_pad // tile_batch

    # ---- input: bf16, pad only if actually needed (avoid extra HBM passes) ----
    if B_pad == B and D_pad == D:
        xp = x if x.dtype == jnp.bfloat16 else x.astype(jnp.bfloat16)
    else:
        xp = jnp.zeros((B_pad, D_pad), jnp.bfloat16)
        xp = xp.at[:B, :D].set(x.astype(jnp.bfloat16))

    kernel = _make_qnet_kernel(num_linear, activation_type)

    def _const_spec(shape):
        # Resident for the whole kernel (constant index_map). Single-buffer
        # when there is actually a pipeline; otherwise leave defaults.
        if num_steps > 1:
            return pl.BlockSpec(shape, lambda i: (0, 0), pipeline_mode=pl.Buffered(1))
        return pl.BlockSpec(shape, lambda i: (0, 0))

    in_specs = [pl.BlockSpec((tile_batch, D_pad), lambda i: (i, 0))]
    flat_params = []
    for (wp, bp) in padded_params:
        in_specs.append(_const_spec(wp.shape))
        in_specs.append(_const_spec(bp.shape))
        flat_params.extend([wp, bp])

    out_spec = pl.BlockSpec((tile_batch, A_pad), lambda i: (i, 0))

    # ---- compiler params: raise scoped VMEM only when the estimate needs it ----
    vmem_est = _vmem_estimate_bytes(tile_batch, pdims, num_steps)
    compiler_kwargs = dict(dimension_semantics=("parallel",))
    if vmem_est > 12 * 1024 * 1024:
        compiler_kwargs["vmem_limit_bytes"] = int(min(2 * vmem_est, 64 * 1024 * 1024))

    out_padded = pl.pallas_call(
        kernel,
        out_shape=jax.ShapeDtypeStruct((B_pad, A_pad), jnp.float32),
        grid=(num_steps,),
        in_specs=in_specs,
        out_specs=out_spec,
        compiler_params=pltpu.CompilerParams(**compiler_kwargs),
    )(xp, *flat_params)

    if B_pad == B and A_pad == num_actions:
        return out_padded
    return out_padded[:B, :num_actions]


def init_qnet_params(key, input_dim, num_actions, num_hidden=2, hidden_size=128):
    """Deterministic init mimicking PyTorch Linear defaults (uniform +/-1/sqrt(fan_in)).

    Returns a list of (W, b) with W: (in, out), b: (1, out).
    """
    dims = [input_dim] + [hidden_size] * (num_hidden + 1) + [num_actions]
    params = []
    for i in range(len(dims) - 1):
        fan_in, fan_out = dims[i], dims[i + 1]
        key, kw, kb = jax.random.split(key, 3)
        bound = 1.0 / jnp.sqrt(fan_in)
        w = jax.random.uniform(kw, (fan_in, fan_out), jnp.float32, -bound, bound)
        b = jax.random.uniform(kb, (1, fan_out), jnp.float32, -bound, bound)
        params.append((w, b))
    return params


def qnet_reference(x, params, activation_type="relu", bf16_matmul=False):
    """Plain-JAX reference (mirrors the PyTorch nn.Sequential forward).

    bf16_matmul=True replicates the kernel's bf16-operand / f32-accum matmuls.
    """
    h = x.astype(jnp.float32)
    for layer, (w, b) in enumerate(params):
        if bf16_matmul:
            h = jnp.dot(h.astype(jnp.bfloat16), w.astype(jnp.bfloat16),
                        preferred_element_type=jnp.float32) + b.astype(jnp.float32)
        else:
            h = h @ w + b
        if layer < len(params) - 1:
            h = jnp.maximum(h, 0.0) if activation_type == "relu" else jnp.tanh(h)
    return h


if __name__ == "__main__":
    # Small shapes consistent with Qnet(num_actions, input_dim, num_hidden=2,
    # hidden_size=...) acting on a flat state vector.
    batch = 8
    input_dim = 32
    hidden_size = 128
    num_hidden = 2
    num_actions = 8

    key = jax.random.PRNGKey(0)
    key, kx = jax.random.split(key)
    x = jax.random.normal(kx, (batch, input_dim), jnp.float32)

    params = init_qnet_params(
        key, input_dim, num_actions, num_hidden=num_hidden, hidden_size=hidden_size
    )

    # --- small-batch (single grid step) path ---
    out = qnet_forward(x, params, activation_type="relu")
    out = jax.block_until_ready(out)
    assert out.shape == (batch, num_actions)

    ref_bf16 = qnet_reference(x, params, activation_type="relu", bf16_matmul=True)
    ref_f32 = qnet_reference(x, params, activation_type="relu", bf16_matmul=False)
    assert jnp.allclose(out, ref_bf16, atol=2e-3, rtol=2e-3), "mismatch vs bf16 reference"
    assert jnp.allclose(out, ref_f32, atol=5e-2, rtol=5e-2), "mismatch vs f32 reference"

    # --- medium-batch (multi-step, even grid) path ---
    key, kx2 = jax.random.split(key)
    x2 = jax.random.normal(kx2, (300, input_dim), jnp.float32)
    out2 = qnet_forward(x2, params, activation_type="relu")
    out2 = jax.block_until_ready(out2)
    assert out2.shape == (300, num_actions)
    ref2 = qnet_reference(x2, params, activation_type="relu", bf16_matmul=True)
    assert jnp.allclose(out2, ref2, atol=2e-3, rtol=2e-3), "mismatch vs bf16 reference (tiled)"

    print("KERNEL_OK")
</pallas_src>

<mosaic_0001>
module attributes {stable_mosaic.version = 11 : i64} {
  func.func @kernel(%arg0: i32, %arg1: memref<16x128xbf16, #tpu.memory_space<vmem>>, %arg2: memref<128x128xbf16, #tpu.memory_space<vmem>>, %arg3: memref<1x128xf32, #tpu.memory_space<vmem>>, %arg4: memref<128x128xbf16, #tpu.memory_space<vmem>>, %arg5: memref<1x128xf32, #tpu.memory_space<vmem>>, %arg6: memref<128x128xbf16, #tpu.memory_space<vmem>>, %arg7: memref<1x128xf32, #tpu.memory_space<vmem>>, %arg8: memref<128x128xbf16, #tpu.memory_space<vmem>>, %arg9: memref<1x128xf32, #tpu.memory_space<vmem>>, %arg10: memref<16x128xf32, #tpu.memory_space<vmem>>) attributes {dimension_semantics = [#tpu.dimension_semantics<parallel>], iteration_bounds = array<i64: 1>, scalar_prefetch = 0 : i64, scratch_operands = 0 : i64, tpu.core_type = #tpu.core_type<tc>, window_params = [{transform_indices = @transform_0, window_bounds = array<i64: 16, 128>}, {pipeline_mode = #tpu.pipeline_mode<synchronous>, transform_indices = @transform_1, window_bounds = array<i64: 128, 128>}, {pipeline_mode = #tpu.pipeline_mode<synchronous>, transform_indices = @transform_2, window_bounds = array<i64: 1, 128>}, {pipeline_mode = #tpu.pipeline_mode<synchronous>, transform_indices = @transform_3, window_bounds = array<i64: 128, 128>}, {pipeline_mode = #tpu.pipeline_mode<synchronous>, transform_indices = @transform_4, window_bounds = array<i64: 1, 128>}, {pipeline_mode = #tpu.pipeline_mode<synchronous>, transform_indices = @transform_5, window_bounds = array<i64: 128, 128>}, {pipeline_mode = #tpu.pipeline_mode<synchronous>, transform_indices = @transform_6, window_bounds = array<i64: 1, 128>}, {pipeline_mode = #tpu.pipeline_mode<synchronous>, transform_indices = @transform_7, window_bounds = array<i64: 128, 128>}, {pipeline_mode = #tpu.pipeline_mode<synchronous>, transform_indices = @transform_8, window_bounds = array<i64: 1, 128>}, {transform_indices = @transform_9, window_bounds = array<i64: 16, 128>}]} {
    %c0 = arith.constant 0 : index
    %c0_0 = arith.constant 0 : index
    %0 = vector.load %arg1[%c0, %c0_0] : memref<16x128xbf16, #tpu.memory_space<vmem>>, vector<16x128xbf16>
    %c0_1 = arith.constant 0 : index
    %c0_2 = arith.constant 0 : index
    %1 = vector.load %arg2[%c0_1, %c0_2] : memref<128x128xbf16, #tpu.memory_space<vmem>>, vector<128x128xbf16>
    %cst = arith.constant dense<0.000000e+00> : vector<16x128xf32>
    %2 = tpu.matmul %0, %1, %cst {dimension_numbers = #tpu.dot_dimension_numbers<[1], [0], [0], [1], [0, 0, 1, 1], [], []>} : vector<16x128xbf16>, vector<128x128xbf16>, vector<16x128xf32> -> vector<16x128xf32>
    %c0_3 = arith.constant 0 : index
    %c0_4 = arith.constant 0 : index
    %3 = vector.load %arg3[%c0_3, %c0_4] : memref<1x128xf32, #tpu.memory_space<vmem>>, vector<1x128xf32>
    %4 = vector.broadcast %3 : vector<1x128xf32> to vector<16x128xf32>
    %5 = arith.addf %2, %4 : vector<16x128xf32>
    %cst_5 = arith.constant 0.000000e+00 : f32
    %6 = vector.broadcast %cst_5 : f32 to vector<16x128xf32>
    %7 = arith.maximumf %5, %6 : vector<16x128xf32>
    %8 = arith.truncf %7 : vector<16x128xf32> to vector<16x128xbf16>
    %c0_6 = arith.constant 0 : index
    %c0_7 = arith.constant 0 : index
    %9 = vector.load %arg4[%c0_6, %c0_7] : memref<128x128xbf16, #tpu.memory_space<vmem>>, vector<128x128xbf16>
    %cst_8 = arith.constant dense<0.000000e+00> : vector<16x128xf32>
    %10 = tpu.matmul %8, %9, %cst_8 {dimension_numbers = #tpu.dot_dimension_numbers<[1], [0], [0], [1], [0, 0, 1, 1], [], []>} : vector<16x128xbf16>, vector<128x128xbf16>, vector<16x128xf32> -> vector<16x128xf32>
    %c0_9 = arith.constant 0 : index
    %c0_10 = arith.constant 0 : index
    %11 = vector.load %arg5[%c0_9, %c0_10] : memref<1x128xf32, #tpu.memory_space<vmem>>, vector<1x128xf32>
    %12 = vector.broadcast %11 : vector<1x128xf32> to vector<16x128xf32>
    %13 = arith.addf %10, %12 : vector<16x128xf32>
    %cst_11 = arith.constant 0.000000e+00 : f32
    %14 = vector.broadcast %cst_11 : f32 to vector<16x128xf32>
    %15 = arith.maximumf %13, %14 : vector<16x128xf32>
    %16 = arith.truncf %15 : vector<16x128xf32> to vector<16x128xbf16>
    %c0_12 = arith.constant 0 : index
    %c0_13 = arith.constant 0 : index
    %17 = vector.load %arg6[%c0_12, %c0_13] : memref<128x128xbf16, #tpu.memory_space<vmem>>, vector<128x128xbf16>
    %cst_14 = arith.constant dense<0.000000e+00> : vector<16x128xf32>
    %18 = tpu.matmul %16, %17, %cst_14 {dimension_numbers = #tpu.dot_dimension_numbers<[1], [0], [0], [1], [0, 0, 1, 1], [], []>} : vector<16x128xbf16>, vector<128x128xbf16>, vector<16x128xf32> -> vector<16x128xf32>
    %c0_15 = arith.constant 0 : index
    %c0_16 = arith.constant 0 : index
    %19 = vector.load %arg7[%c0_15, %c0_16] : memref<1x128xf32, #tpu.memory_space<vmem>>, vector<1x128xf32>
    %20 = vector.broadcast %19 : vector<1x128xf32> to vector<16x128xf32>
    %21 = arith.addf %18, %20 : vector<16x128xf32>
    %cst_17 = arith.constant 0.000000e+00 : f32
    %22 = vector.broadcast %cst_17 : f32 to vector<16x128xf32>
    %23 = arith.maximumf %21, %22 : vector<16x128xf32>
    %24 = arith.truncf %23 : vector<16x128xf32> to vector<16x128xbf16>
    %c0_18 = arith.constant 0 : index
    %c0_19 = arith.constant 0 : index
    %25 = vector.load %arg8[%c0_18, %c0_19] : memref<128x128xbf16, #tpu.memory_space<vmem>>, vector<128x128xbf16>
    %cst_20 = arith.constant dense<0.000000e+00> : vector<16x128xf32>
    %26 = tpu.matmul %24, %25, %cst_20 {dimension_numbers = #tpu.dot_dimension_numbers<[1], [0], [0], [1], [0, 0, 1, 1], [], []>} : vector<16x128xbf16>, vector<128x128xbf16>, vector<16x128xf32> -> vector<16x128xf32>
    %c0_21 = arith.constant 0 : index
    %c0_22 = arith.constant 0 : index
    %27 = vector.load %arg9[%c0_21, %c0_22] : memref<1x128xf32, #tpu.memory_space<vmem>>, vector<1x128xf32>
    %28 = vector.broadcast %27 : vector<1x128xf32> to vector<16x128xf32>
    %29 = arith.addf %26, %28 : vector<16x128xf32>
    %c0_23 = arith.constant 0 : index
    %c0_24 = arith.constant 0 : index
    %30 = vector.load %arg10[%c0_23, %c0_24] : memref<16x128xf32, #tpu.memory_space<vmem>>, vector<16x128xf32>
    tpu.vector_store %arg10[%c0_23, %c0_24], %29 {strides = array<i32>} : memref<16x128xf32, #tpu.memory_space<vmem>>, vector<16x128xf32>,
    return
  }
  func.func @transform_0(%arg0: i32) -> (i32, i32) {
    %c0_i32 = arith.constant 0 : i32
    %c0_i32_0 = arith.constant 0 : i32
    return %arg0, %c0_i32 : i32, i32
  }
  func.func @transform_1(%arg0: i32) -> (i32, i32) {
    %c0_i32 = arith.constant 0 : i32
    %c0_i32_0 = arith.constant 0 : i32
    %c0_i32_1 = arith.constant 0 : i32
    return %c0_i32, %c0_i32_0 : i32, i32
  }
  func.func @transform_2(%arg0: i32) -> (i32, i32) {
    %c0_i32 = arith.constant 0 : i32
    %c0_i32_0 = arith.constant 0 : i32
    %c0_i32_1 = arith.constant 0 : i32
    return %c0_i32, %c0_i32_0 : i32, i32
  }
  func.func @transform_3(%arg0: i32) -> (i32, i32) {
    %c0_i32 = arith.constant 0 : i32
    %c0_i32_0 = arith.constant 0 : i32
    %c0_i32_1 = arith.constant 0 : i32
    return %c0_i32, %c0_i32_0 : i32, i32
  }
  func.func @transform_4(%arg0: i32) -> (i32, i32) {
    %c0_i32 = arith.constant 0 : i32
    %c0_i32_0 = arith.constant 0 : i32
    %c0_i32_1 = arith.constant 0 : i32
    return %c0_i32, %c0_i32_0 : i32, i32
  }
  func.func @transform_5(%arg0: i32) -> (i32, i32) {
    %c0_i32 = arith.constant 0 : i32
    %c0_i32_0 = arith.constant 0 : i32
    %c0_i32_1 = arith.constant 0 : i32
    return %c0_i32, %c0_i32_0 : i32, i32
  }
  func.func @transform_6(%arg0: i32) -> (i32, i32) {
    %c0_i32 = arith.constant 0 : i32
    %c0_i32_0 = arith.constant 0 : i32
    %c0_i32_1 = arith.constant 0 : i32
    return %c0_i32, %c0_i32_0 : i32, i32
  }
  func.func @transform_7(%arg0: i32) -> (i32, i32) {
    %c0_i32 = arith.constant 0 : i32
    %c0_i32_0 = arith.constant 0 : i32
    %c0_i32_1 = arith.constant 0 : i32
    return %c0_i32, %c0_i32_0 : i32, i32
  }
  func.func @transform_8(%arg0: i32) -> (i32, i32) {
    %c0_i32 = arith.constant 0 : i32
    %c0_i32_0 = arith.constant 0 : i32
    %c0_i32_1 = arith.constant 0 : i32
    return %c0_i32, %c0_i32_0 : i32, i32
  }
  func.func @transform_9(%arg0: i32) -> (i32, i32) {
    %c0_i32 = arith.constant 0 : i32
    %c0_i32_0 = arith.constant 0 : i32
    return %arg0, %c0_i32 : i32, i32
  }
}

</mosaic_0001>

<bundles_post_ra>
// kernel: tpu_custom_call.1
= control target key start
LH: loop header
LB: loop body
LE: loop exit
PB: predicated region body
PF: predicated region fallthrough
CT: control target
= control target key end

     0   :  { %14 = vsyncpa [#allocation3], 0  ;;  %s1061_s0 = inlined_call_operand.hbm [shape: bf16[16,128], index: 0, kind: input, shape index: {}]   ;;  %s1062_s1 = inlined_call_operand.hbm [shape: bf16[128,128], index: 1, kind: input, shape index: {}]   ;;  %s1063_s2 = inlined_call_operand.vmem [shape: f32[1,128], index: 2, kind: input, shape index: {}]   ;;  %s1064_s3 = inlined_call_operand.hbm [shape: bf16[128,128], index: 3, kind: input, shape index: {}]   ;;  %s1065_s4 = inlined_call_operand.vmem [shape: f32[1,128], index: 4, kind: input, shape index: {}]   ;;  %s1066_s5 = inlined_call_operand.hbm [shape: bf16[128,128], index: 5, kind: input, shape index: {}]   ;;  %s1067_s6 = inlined_call_operand.vmem [shape: f32[1,128], index: 6, kind: input, shape index: {}]   ;;  %s1068_s7 = inlined_call_operand.hbm [shape: bf16[128,128], index: 7, kind: input, shape index: {}]   ;;  %s1069_s8 = inlined_call_operand.vmem [shape: f32[1,128], index: 8, kind: input, shape index: {}]   ;;  %s1070_s9 = inlined_call_operand.hbm [shape: f32[16,128], index: 9, kind: output, shape index: {}]  }
   0x1   :  { %15 = vsyncpa [#allocation6], 0 }
   0x2   :  { %16 = vsyncpa [#allocation9], 0 }
   0x3   :  { %17 = vsyncpa [#allocation4], 0  ;;  %s914_s30 = smov [#allocation5]   ;;  %s915_s11 = smov [#allocation8]  }
   0x4   :  { %s35_s10 = sshll.u32 %s914_s30, 4  ;;  %s63_s12 = sshll.u32 %s915_s11, 4  ;;  %s36_s10 = int_to_ptr.vmem [resolvable:$true] %s35_s10  ;;  %s64_s12 = int_to_ptr.vmem [resolvable:$true] %s63_s12 }
   0x5   :  { %s794_s13 = scalar_lea.vmem %s36_s10, 1024  ;;  %p799_p1 = scmp.lt.s32.totalorder %s36_s10, %s36_s10 }
   0x6   :  { %p795_p0 = scmp.ne.s32.totalorder %s36_s10, %s794_s13  ;;  %p800_p2 = scmp.lt.s32.totalorder %s794_s13, %s794_s13 }
   0x8   :  { %p801_p3 = por %p800_p2, %p799_p1 }
   0xa   :  { %p802_p4 = pnand %p801_p3, %p795_p0 }
   0xc   :  { %805 = shalt.err (!%p802_p4)
}
   0xd   :  { %s916_s14 = smov 64   ;;  %s917_s15 = smov 4  }
   0xe   :  { %41 = dma.hbm_to_vmem [thread:$0]  %s1062_s1, 1024, %s36_s10, [#allocation6], %s916_s14, %s916_s14, %s917_s15  }
   0xf   :  { %s814_s18 = scalar_lea.vmem %s64_s12, 1024  ;;  %p819_p6 = scmp.lt.s32.totalorder %s64_s12, %s64_s12 }
  0x10   :  { %p815_p5 = scmp.ne.s32.totalorder %s64_s12, %s814_s18  ;;  %p820_p7 = scmp.lt.s32.totalorder %s814_s18, %s814_s18 }
  0x12   :  { %p821_p8 = por %p820_p7, %p819_p6 }
  0x14   :  { %p822_p9 = pnand %p821_p8, %p815_p5 }
  0x16   :  { %825 = shalt.err (!%p822_p9)
}
  0x17   :  { %69 = dma.hbm_to_vmem [thread:$0]  %s1066_s5, 1024, %s64_s12, [#allocation9], %s916_s14, %s916_s14, %s917_s15  }
  0x18   :  { %s918_s21 = smov [#allocation2]   ;;  %s919_s23 = smov [#allocation7]  }
  0x19   :  { %s23_s22 = sshll.u32 %s918_s21, 4  ;;  %s49_s24 = sshll.u32 %s919_s23, 4  ;;  %s24_s22 = int_to_ptr.vmem [resolvable:$true] %s23_s22  ;;  %s50_s24 = int_to_ptr.vmem [resolvable:$true] %s49_s24 }
  0x1a   :  { %s834_s1 = scalar_lea.vmem %s24_s22, 128  ;;  %p839_p11 = scmp.lt.s32.totalorder %s24_s22, %s24_s22 }
  0x1b   :  { %p835_p10 = scmp.ne.s32.totalorder %s24_s22, %s834_s1  ;;  %p840_p12 = scmp.lt.s32.totalorder %s834_s1, %s834_s1 }
  0x1d   :  { %p841_p13 = por %p840_p12, %p839_p11 }
  0x1f   :  { %p842_p0 = pnand %p841_p13, %p835_p10 }
  0x21   :  { %845 = shalt.err (!%p842_p0)
}
  0x22   :  { %29 = dma.hbm_to_vmem [thread:$0]  %s1061_s0, 128, %s24_s22, [#allocation3], %s916_s14, %s916_s14, %s917_s15  }
  0x23   :  { %s854_s5 = scalar_lea.vmem %s50_s24, 1024  ;;  %p859_p2 = scmp.lt.s32.totalorder %s50_s24, %s50_s24 }
  0x24   :  { %p855_p1 = scmp.ne.s32.totalorder %s50_s24, %s854_s5  ;;  %p860_p3 = scmp.lt.s32.totalorder %s854_s5, %s854_s5 }
  0x26   :  { %p861_p4 = por %p860_p3, %p859_p2 }
  0x28   :  { %p862_p5 = pnand %p861_p4, %p855_p1 }
  0x2a   :  { %865 = shalt.err (!%p862_p5)
}
  0x2b   :  { %55 = dma.hbm_to_vmem [thread:$0]  %s1064_s3, 1024, %s50_s24, [#allocation6], %s916_s14, %s916_s14, %s917_s15  }
  0x2c   :  { %s920_s29 = smov [#allocation10]  }
  0x2d   :  { %s77_s30 = sshll.u32 %s920_s29, 4  ;;  %s78_s30 = int_to_ptr.vmem [resolvable:$true] %s77_s30 }
  0x2e   :  { %s874_s10 = scalar_lea.vmem %s78_s30, 1024  ;;  %p879_p7 = scmp.lt.s32.totalorder %s78_s30, %s78_s30 }
  0x2f   :  { %p875_p6 = scmp.ne.s32.totalorder %s78_s30, %s874_s10  ;;  %p880_p8 = scmp.lt.s32.totalorder %s874_s10, %s874_s10 }
  0x31   :  { %p881_p9 = por %p880_p8, %p879_p7 }
  0x33   :  { %p882_p10 = pnand %p881_p9, %p875_p6 }
  0x35   :  { %885 = shalt.err (!%p882_p10)
}
  0x36   :  { %83 = dma.hbm_to_vmem [thread:$0]  %s1068_s7, 1024, %s78_s30, [#allocation9], %s916_s14, %s916_s14, %s917_s15  }
  0x37   :  { %906 = dma.done.wait [#allocation3], 128  }
  0x38   :  { %907 = vsyncadd [#allocation3], 4294967168 }
  0x39   :  { %908 = dma.done.wait [#allocation6], 2048  }
  0x3a   :  { %909 = vsyncadd [#allocation6], 4294965248 }
  0x3b   :  { %910 = dma.done.wait [#allocation9], 2048  }
  0x3c   :  { %911 = vsyncadd [#allocation9], 4294965248  ;;  %v921_v0 = vmov 0.0   ;;  %vm922_vm0 = vmmov 0   ;;  %v753_v1 = vld [vmem:[#allocation5 + $0x38] sm:$0xff]   ;;  %v754_v2 = vld [vmem:[#allocation5 + $0x30] sm:$0xff]  }
  0x3d   :  { %661 = vmatprep.subr.bf16.mxu0 %v921_v0  ;;  %677 = vmatprep.mubr.msk.bf16.mxu0 %vm922_vm0, %v921_v0  ;;  %v755_v3 = vld [vmem:[#allocation5 + $0x28] sm:$0xff]   ;;  %v762_v4 = vld [vmem:[#allocation7 + $0x38] sm:$0xff]   ;;  %v756_v5 = vld [vmem:[#allocation5 + $0x20] sm:$0xff]   ;;  %s923_s16 = smov [#allocation11]  }
  0x3e   :  { %681 = vmatprep.subr.bf16.mxu1 %v921_v0  ;;  %697 = vmatprep.mubr.msk.bf16.mxu1 %vm922_vm0, %v921_v0  ;;  %v763_v6 = vld [vmem:[#allocation7 + $0x30] sm:$0xff]   ;;  %v757_v7 = vld [vmem:[#allocation5 + $0x18] sm:$0xff]   ;;  %v764_v8 = vld [vmem:[#allocation7 + $0x28] sm:$0xff]   ;;  %s574_s17 = sshll.u32 %s923_s16, 4  ;;  %s575_s17 = int_to_ptr.vmem [resolvable:$true] %s574_s17 }
  0x3f   :  { %662 = vmatpush3.bf16.msra.mxu0 %v753_v1  ;;  %682 = vmatpush3.bf16.msra.mxu1 %v762_v4  ;;  %v758_v9 = vld [vmem:[#allocation5 + $0x10] sm:$0xff]   ;;  %v765_v10 = vld [vmem:[#allocation7 + $0x20] sm:$0xff]   ;;  %v759_v11 = vld [vmem:[#allocation5 + $0x8] sm:$0xff]   ;;  %p891_p12 = scmp.lt.s32.totalorder %s575_s17, %s575_s17 }
  0x40   :  { %663 = vmatprep.subr.bf16.mxu0 %v921_v0  ;;  %683 = vmatprep.subr.bf16.mxu1 %v921_v0  ;;  %v766_v12 = vld [vmem:[#allocation7 + $0x18] sm:$0xff]   ;;  %v760_v13 = vld [vmem:[#allocation5] sm:$0xff]   ;;  %v767_v15 = vld [vmem:[#allocation7 + $0x10] sm:$0xff]  }
  0x41   :  { %v761_v14 = vld [vmem:[#allocation2] sm:$0xff]   ;;  %v768_v16 = vld [vmem:[#allocation7 + $0x8] sm:$0xff]   ;;  %v769_v17 = vld [vmem:[#allocation7] sm:$0xff]  }
  0x42   :  { %v770_v18 = vld [vmem:[#allocation8 + $0x38] sm:$0xff]   ;;  %v771_v19 = vld [vmem:[#allocation8 + $0x30] sm:$0xff]   ;;  %v772_v20 = vld [vmem:[#allocation8 + $0x28] sm:$0xff]  }
  0x43   :  { %664 = vmatpush3.bf16.msra.mxu0 %v754_v2  ;;  %684 = vmatpush3.bf16.msra.mxu1 %v763_v6  ;;  %v773_v21 = vld [vmem:[#allocation8 + $0x20] sm:$0xff]   ;;  %v774_v22 = vld [vmem:[#allocation8 + $0x18] sm:$0xff]   ;;  %v775_v33 = vld [vmem:[#allocation8 + $0x10] sm:$0xff]  }
  0x44   :  { %665 = vmatprep.subr.bf16.mxu0 %v921_v0  ;;  %685 = vmatprep.subr.bf16.mxu1 %v921_v0  ;;  %v588_v23 = vld [vmem:[%s1063_s2] ss:$0 sm:$0xff]  ;;  %v776_v34 = vld [vmem:[#allocation8 + $0x8] sm:$0xff]   ;;  %v777_v35 = vld [vmem:[#allocation8] sm:$0xff]  }
  0x45   :  { %v778_v36 = vld [vmem:[#allocation10 + $0x38] sm:$0xff]   ;;  %v779_v37 = vld [vmem:[#allocation10 + $0x30] sm:$0xff]   ;;  %v780_v38 = vld [vmem:[#allocation10 + $0x28] sm:$0xff]  }
  0x46   :  { %v781_v39 = vld [vmem:[#allocation10 + $0x20] sm:$0xff]   ;;  %v782_v40 = vld [vmem:[#allocation10 + $0x18] sm:$0xff]   ;;  %v783_v51 = vld [vmem:[#allocation10 + $0x10] sm:$0xff]  }
  0x47   :  { %666 = vmatpush3.bf16.msra.mxu0 %v755_v3  ;;  %686 = vmatpush3.bf16.msra.mxu1 %v764_v8  ;;  %v598_v41 = vld [vmem:[%s1065_s4] ss:$0 sm:$0xff]  ;;  %v784_v52 = vld [vmem:[#allocation10 + $0x8] sm:$0xff]   ;;  %v785_v53 = vld [vmem:[#allocation10] sm:$0xff]  }
  0x48   :  { %667 = vmatprep.subr.bf16.mxu0 %v921_v0  ;;  %687 = vmatprep.subr.bf16.mxu1 %v921_v0  ;;  %v607_v54 = vld [vmem:[%s1067_s6] ss:$0 sm:$0xff]  ;;  %s886_s6 = scalar_lea.vmem %s575_s17, 256 }
  0x49   :  { %p887_p11 = scmp.ne.s32.totalorder %s575_s17, %s886_s6  ;;  %p892_p13 = scmp.lt.s32.totalorder %s886_s6, %s886_s6 }
  0x4b   :  { %668 = vmatpush3.bf16.msra.mxu0 %v756_v5  ;;  %688 = vmatpush3.bf16.msra.mxu1 %v765_v10  ;;  %p893_p0 = por %p892_p13, %p891_p12 }
  0x4c   :  { %669 = vmatprep.subr.bf16.mxu0 %v921_v0  ;;  %689 = vmatprep.subr.bf16.mxu1 %v921_v0 }
  0x4d   :  { %p894_p1 = pnand %p893_p0, %p887_p11 }
  0x4f   :  { %670 = vmatpush3.bf16.msra.mxu0 %v757_v7  ;;  %690 = vmatpush3.bf16.msra.mxu1 %v766_v12 }
  0x50   :  { %671 = vmatprep.subr.bf16.mxu0 %v921_v0  ;;  %691 = vmatprep.subr.bf16.mxu1 %v921_v0 }
  0x53   :  { %672 = vmatpush3.bf16.msra.mxu0 %v758_v9  ;;  %692 = vmatpush3.bf16.msra.mxu1 %v767_v15 }
  0x54   :  { %673 = vmatprep.subr.bf16.mxu0 %v921_v0  ;;  %693 = vmatprep.subr.bf16.mxu1 %v921_v0 }
  0x57   :  { %674 = vmatpush3.bf16.msra.mxu0 %v759_v11  ;;  %694 = vmatpush3.bf16.msra.mxu1 %v768_v16 }
  0x58   :  { %675 = vmatprep.subr.bf16.mxu0 %v921_v0  ;;  %695 = vmatprep.subr.bf16.mxu1 %v921_v0 }
  0x5b   :  { %676 = vmatpush3.bf16.msra.mxu0 %v760_v13  ;;  %696 = vmatpush3.bf16.msra.mxu1 %v769_v17 }
  0x5c   :  { %701 = vmatprep.subr.bf16.mxu0 %v921_v0  ;;  %721 = vmatprep.subr.bf16.mxu1 %v921_v0 }
  0x5e   :  { %678 = vmatmul.mubr.bf16.vlgmr.msra.gmra.mxu0 %v761_v14 }
  0x5f   :  { %717 = vmatprep.mubr.msk.bf16.mxu0 %vm922_vm0, %v921_v0  ;;  %702 = vmatpush3.bf16.msra.mxu0 %v770_v18 }
  0x60   :  { %703 = vmatprep.subr.bf16.mxu0 %v921_v0 }
  0x63   :  { %704 = vmatpush3.bf16.msra.mxu0 %v771_v19 }
  0x64   :  { %705 = vmatprep.subr.bf16.mxu0 %v921_v0 }
  0x67   :  { %706 = vmatpush3.bf16.msra.mxu0 %v772_v20 }
  0x68   :  { %707 = vmatprep.subr.bf16.mxu0 %v921_v0 }
  0x6b   :  { %708 = vmatpush3.bf16.msra.mxu0 %v773_v21 }
  0x6c   :  { %709 = vmatprep.subr.bf16.mxu0 %v921_v0 }
  0x6f   :  { %710 = vmatpush3.bf16.msra.mxu0 %v774_v22 }
  0x70   :  { %711 = vmatprep.subr.bf16.mxu0 %v921_v0 }
  0x73   :  { %712 = vmatpush3.bf16.msra.mxu0 %v775_v33 }
  0x74   :  { %713 = vmatprep.subr.bf16.mxu0 %v921_v0 }
  0x77   :  { %714 = vmatpush3.bf16.msra.mxu0 %v776_v34 }
  0x78   :  { %715 = vmatprep.subr.bf16.mxu0 %v921_v0 }
  0x7b   :  { %716 = vmatpush3.bf16.msra.mxu0 %v777_v35 }
 0x11e   :  { %v215_v24 = vpop.f32.mrf.mxu0 }
 0x11f   :  { %v216_v26 = vadd.f32 %v588_v23, %v215_v24 }
 0x120   :  { %v679_v25 = vpop.f32.mrf.mxu0 }
 0x121   :  { %v222_v30 = vmax.f32 %v216_v26, 0.0 }
 0x122   :  { %v218_v27 = vpop.f32.mrf.mxu0 }
 0x123   :  { %v219_v28 = vadd.f32 %v588_v23, %v218_v27 }
 0x124   :  { %v680_v29 = vpop.f32.mrf.mxu0 }
 0x125   :  { %v223_v31 = vmax.f32 %v219_v28, 0.0 }
 0x127   :  { %v224_v32 = vpack.c.bf16 %v223_v31, %v222_v30 }
 0x129   :  { %698 = vmatmul.mubr.bf16.vlgmr.msra.gmra.mxu1 %v224_v32 }
 0x12a   :  { %737 = vmatprep.mubr.msk.bf16.mxu1 %vm922_vm0, %v921_v0  ;;  %722 = vmatpush3.bf16.msra.mxu1 %v778_v36 }
 0x12b   :  { %723 = vmatprep.subr.bf16.mxu1 %v921_v0 }
 0x12e   :  { %724 = vmatpush3.bf16.msra.mxu1 %v779_v37 }
 0x12f   :  { %725 = vmatprep.subr.bf16.mxu1 %v921_v0 }
 0x132   :  { %726 = vmatpush3.bf16.msra.mxu1 %v780_v38 }
 0x133   :  { %727 = vmatprep.subr.bf16.mxu1 %v921_v0 }
 0x136   :  { %728 = vmatpush3.bf16.msra.mxu1 %v781_v39 }
 0x137   :  { %729 = vmatprep.subr.bf16.mxu1 %v921_v0 }
 0x13a   :  { %730 = vmatpush3.bf16.msra.mxu1 %v782_v40 }
 0x13b   :  { %731 = vmatprep.subr.bf16.mxu1 %v921_v0 }
 0x13e   :  { %732 = vmatpush3.bf16.msra.mxu1 %v783_v51 }
 0x13f   :  { %733 = vmatprep.subr.bf16.mxu1 %v921_v0 }
 0x142   :  { %734 = vmatpush3.bf16.msra.mxu1 %v784_v52 }
 0x143   :  { %735 = vmatprep.subr.bf16.mxu1 %v921_v0  ;;  %v616_v0 = vld [vmem:[%s1069_s8] ss:$0 sm:$0xff] }
 0x146   :  { %736 = vmatpush3.bf16.msra.mxu1 %v785_v53 }
 0x1e9   :  { %v330_v42 = vpop.f32.mrf.mxu1 }
 0x1ea   :  { %v331_v44 = vadd.f32 %v598_v41, %v330_v42 }
 0x1eb   :  { %v699_v43 = vpop.f32.mrf.mxu1 }
 0x1ec   :  { %v337_v48 = vmax.f32 %v331_v44, 0.0 }
 0x1ed   :  { %v333_v45 = vpop.f32.mrf.mxu1 }
 0x1ee   :  { %v334_v46 = vadd.f32 %v598_v41, %v333_v45 }
 0x1ef   :  { %v700_v47 = vpop.f32.mrf.mxu1 }
 0x1f0   :  { %v338_v49 = vmax.f32 %v334_v46, 0.0 }
 0x1f2   :  { %v339_v50 = vpack.c.bf16 %v338_v49, %v337_v48 }
 0x1f4   :  { %718 = vmatmul.mubr.bf16.vlgmr.msra.gmra.mxu0 %v339_v50 }
 0x2b4   :  { %v445_v55 = vpop.f32.mrf.mxu0 }
 0x2b5   :  { %v446_v57 = vadd.f32 %v607_v54, %v445_v55 }
 0x2b6   :  { %v719_v56 = vpop.f32.mrf.mxu0 }
 0x2b7   :  { %v452_v61 = vmax.f32 %v446_v57, 0.0 }
 0x2b8   :  { %v448_v58 = vpop.f32.mrf.mxu0 }
 0x2b9   :  { %v449_v59 = vadd.f32 %v607_v54, %v448_v58 }
 0x2ba   :  { %v720_v60 = vpop.f32.mrf.mxu0 }
 0x2bb   :  { %v453_v62 = vmax.f32 %v449_v59, 0.0 }
 0x2bd   :  { %v454_v63 = vpack.c.bf16 %v453_v62, %v452_v61 }
 0x2bf   :  { %738 = vmatmul.mubr.bf16.vlgmr.msra.gmra.mxu1 %v454_v63 }
 0x37f   :  { %v560_v1 = vpop.f32.mrf.mxu1 }
 0x380   :  { %v561_v2 = vadd.f32 %v616_v0, %v560_v1 }
 0x381   :  { %v739_v3 = vpop.f32.mrf.mxu1 }
 0x382   :  { %567 = vst [vmem:[#allocation11] sm:$0xff] %v561_v2 }
 0x383   :  { %v563_v4 = vpop.f32.mrf.mxu1 }
 0x384   :  { %v564_v5 = vadd.f32 %v616_v0, %v563_v4 }
 0x385   :  { %v740_v6 = vpop.f32.mrf.mxu1 }
 0x386   :  { %568 = vst [vmem:[#allocation11 + $0x8] sm:$0xff] %v564_v5 }
 0x387   :  { %897 = shalt.err (!%p894_p1)
}
 0x388   :  { %s924_s18 = smov 128   ;;  %s925_s8 = smov 8  }
 0x389   :  { %580 = dma.vmem_to_hbm [thread:$0]  %s575_s17, 256, %s1070_s9, [#allocation4], %s924_s18, %s924_s18, %s925_s8  }
 0x38a   :  { %912 = dma.done.wait [#allocation4], 256  }
 0x38b   :  { %913 = vsyncadd [#allocation4], 4294967040 }
 0x38c   :  { %584 = vsyncpa [#allocation3], 1 }
 0x38d   :  { %585 = vsyncpa [#allocation6], 1 }
 0x38e   :  { %586 = vsyncpa [#allocation9], 1 }
 0x38f   :  { %587 = vsyncpa [#allocation4], 1 }

</bundles_post_ra>
